<compile_context>
chip_gen: v7x
topology: tpu7x:2x2x1
jax: 0.10.0
libtpu: 0.0.40
codegen_flags: <defaults>
</compile_context>

<pallas_src>
import jax
import jax.numpy as jnp
from jax import lax
from jax.experimental import pallas as pl
from jax.experimental.pallas import tpu as pltpu

MAX_TILE_B = 16384          # batch rows per grid step; multiple of 512 (sweep 16K-32K)
_VMEM_LIMIT_BYTES = 40 * 1024 * 1024   # covers double-buffered blocks at MAX_TILE_B


def _round_up(n, m):
    return ((n + m - 1) // m) * m


def _pick_tile(batch, max_tile=MAX_TILE_B):
    """Aim for >= ~4 grid steps (megacore sharding + pipelining) without
    exceeding max_tile; always a multiple of 512 and at least 512."""
    target = _round_up(max(1, -(-batch // 4)), 512)
    return max(512, min(max_tile, target))


def _mlp_kernel(x_ref, w1_ref, b1_ref, w2_ref, b2_ref, o_ref):
    # x_ref: (tile_b, 10) -- natural layout, batch on sublanes.
    # w1_ref: (5, 10), b1_ref: (5, 1), w2_ref: (2, 5), b2_ref: (2, 1)
    # o_ref: (2, tile_b) -- transposed output, batch on the 128-lane axis.
    x = x_ref[...]
    # h = W1 @ x^T, expressed as dot_general contracting the LAST dim of both
    # operands ("NT" matmul, same dimension numbers einsum 'oj,nj->on' emits).
    # Result (5, tile_b): the MXU performs the batch sublane->lane rotation.
    h = lax.dot_general(
        w1_ref[...], x,
        dimension_numbers=(((1,), (1,)), ((), ())),
        preferred_element_type=jnp.float32,
    )                                                   # (5, tile_b)
    h = jnp.maximum(h + b1_ref[...], 0.0)               # bias + ReLU, lane-dense VPU
    y = jnp.dot(w2_ref[...], h,
                preferred_element_type=jnp.float32)     # (2, tile_b)
    o_ref[...] = (y + b2_ref[...]).astype(o_ref.dtype)  # unmasked lane-dense stores


def simple_model_forward(x, w1, b1, w2, b2, *, tile_b=None):
    """Forward pass of SimpleModel.

    x:  (B, 10) float32
    w1: (5, 10)  b1: (5,)   -- PyTorch (out_features, in_features) layout
    w2: (2, 5)   b2: (2,)
    Returns (B, 2) float32.
    """
    B, in_f = x.shape
    hid = w1.shape[0]
    out_f = w2.shape[0]

    if tile_b is None:
        tile_b = _pick_tile(B)
    num_tiles = -(-B // tile_b)
    Bp = num_tiles * tile_b

    # Tail-only padding (zeros) when B is not tile-aligned; padded rows produce
    # finite per-column-independent garbage that is sliced off below.
    if Bp != B:
        x = jnp.pad(x, ((0, Bp - B), (0, 0)))

    b1c = b1.reshape(hid, 1)
    b2c = b2.reshape(out_f, 1)

    outT = pl.pallas_call(
        _mlp_kernel,
        out_shape=jax.ShapeDtypeStruct((out_f, Bp), x.dtype),
        grid=(num_tiles,),
        in_specs=[
            # x streams along the batch grid axis in its natural layout:
            # exactly one HBM read of x.
            pl.BlockSpec((tile_b, in_f), lambda i: (i, 0)),
            # Weights / biases: constant block index -> fetched once, VMEM-resident.
            pl.BlockSpec((hid, in_f), lambda i: (0, 0)),
            pl.BlockSpec((hid, 1), lambda i: (0, 0)),
            pl.BlockSpec((out_f, hid), lambda i: (0, 0)),
            pl.BlockSpec((out_f, 1), lambda i: (0, 0)),
        ],
        # Transposed output: batch on the lane axis -> unmasked vst.
        out_specs=pl.BlockSpec((out_f, tile_b), lambda i: (0, i)),
        compiler_params=pltpu.CompilerParams(
            dimension_semantics=("parallel",),
            vmem_limit_bytes=_VMEM_LIMIT_BYTES,
        ),
    )(x, w1, b1c, w2, b2c)

    # Drop batch padding and restore the module's (B, 2) output layout
    # (tiny: 8 bytes per row).
    return outT[:, :B].T


def _init_params(key):
    """Deterministic init mimicking nn.Linear default (uniform(+-1/sqrt(fan_in))),
    stored in PyTorch's (out_features, in_features) layout."""
    k1, k2, k3, k4 = jax.random.split(key, 4)
    bound1 = 1.0 / (10 ** 0.5)
    bound2 = 1.0 / (5 ** 0.5)
    w1 = jax.random.uniform(k1, (5, 10), jnp.float32, -bound1, bound1)
    b1 = jax.random.uniform(k2, (5,), jnp.float32, -bound1, bound1)
    w2 = jax.random.uniform(k3, (2, 5), jnp.float32, -bound2, bound2)
    b2 = jax.random.uniform(k4, (2,), jnp.float32, -bound2, bound2)
    return w1, b1, w2, b2


def _reference(x, w1, b1, w2, b2):
    return jnp.maximum(x @ w1.T + b1, 0.0) @ w2.T + b2


if __name__ == "__main__":
    key = jax.random.PRNGKey(0)
    kx, kp, kx2 = jax.random.split(key, 3)
    w1, b1, w2, b2 = _init_params(kp)

    # Small batch (single 512-wide tile).
    x_small = jax.random.normal(kx, (8, 10), jnp.float32)
    out_small = jax.block_until_ready(simple_model_forward(x_small, w1, b1, w2, b2))
    ref_small = _reference(x_small, w1, b1, w2, b2)
    assert out_small.shape == (8, 2)
    assert jnp.allclose(out_small, ref_small, atol=1e-5, rtol=1e-5)

    # Non-tile-aligned batch: exercises the multi-step grid (2 steps -> both
    # v7x TensorCores) and the tail-padding / output-slice path.
    x_big = jax.random.normal(kx2, (1000, 10), jnp.float32)
    out_big = jax.block_until_ready(simple_model_forward(x_big, w1, b1, w2, b2))
    ref_big = _reference(x_big, w1, b1, w2, b2)
    assert out_big.shape == (1000, 2)
    assert jnp.allclose(out_big, ref_big, atol=1e-5, rtol=1e-5)

    print("KERNEL_OK")
</pallas_src>

<mosaic_0001>
module attributes {stable_mosaic.version = 11 : i64} {
  func.func @_mlp_kernel(%arg0: i32, %arg1: memref<512x10xf32, #tpu.memory_space<vmem>>, %arg2: memref<5x10xf32, #tpu.memory_space<vmem>>, %arg3: memref<5x1xf32, #tpu.memory_space<vmem>>, %arg4: memref<2x5xf32, #tpu.memory_space<vmem>>, %arg5: memref<2x1xf32, #tpu.memory_space<vmem>>, %arg6: memref<2x512xf32, #tpu.memory_space<vmem>>) attributes {dimension_semantics = [#tpu.dimension_semantics<parallel>], iteration_bounds = array<i64: 1>, scalar_prefetch = 0 : i64, scratch_operands = 0 : i64, tpu.core_type = #tpu.core_type<tc>, window_params = [{transform_indices = @transform_0, window_bounds = array<i64: 512, 10>}, {pipeline_mode = #tpu.pipeline_mode<synchronous>, transform_indices = @transform_1, window_bounds = array<i64: 5, 10>}, {pipeline_mode = #tpu.pipeline_mode<synchronous>, transform_indices = @transform_2, window_bounds = array<i64: 5, 1>}, {pipeline_mode = #tpu.pipeline_mode<synchronous>, transform_indices = @transform_3, window_bounds = array<i64: 2, 5>}, {pipeline_mode = #tpu.pipeline_mode<synchronous>, transform_indices = @transform_4, window_bounds = array<i64: 2, 1>}, {transform_indices = @transform_5, window_bounds = array<i64: 2, 512>}]} {
    %c0 = arith.constant 0 : index
    %c0_0 = arith.constant 0 : index
    %0 = vector.load %arg1[%c0, %c0_0] : memref<512x10xf32, #tpu.memory_space<vmem>>, vector<512x10xf32>
    %c0_1 = arith.constant 0 : index
    %c0_2 = arith.constant 0 : index
    %1 = vector.load %arg2[%c0_1, %c0_2] : memref<5x10xf32, #tpu.memory_space<vmem>>, vector<5x10xf32>
    %cst = arith.constant dense<0.000000e+00> : vector<5x512xf32>
    %2 = tpu.matmul %1, %0, %cst {dimension_numbers = #tpu.dot_dimension_numbers<[1], [1], [0], [0], [0, 0, 1, 0], [], []>} : vector<5x10xf32>, vector<512x10xf32>, vector<5x512xf32> -> vector<5x512xf32>
    %c0_3 = arith.constant 0 : index
    %c0_4 = arith.constant 0 : index
    %3 = vector.load %arg3[%c0_3, %c0_4] : memref<5x1xf32, #tpu.memory_space<vmem>>, vector<5x1xf32>
    %4 = vector.broadcast %3 : vector<5x1xf32> to vector<5x512xf32>
    %5 = arith.addf %2, %4 : vector<5x512xf32>
    %cst_5 = arith.constant 0.000000e+00 : f32
    %6 = vector.broadcast %cst_5 : f32 to vector<5x512xf32>
    %7 = arith.maximumf %5, %6 : vector<5x512xf32>
    %c0_6 = arith.constant 0 : index
    %c0_7 = arith.constant 0 : index
    %8 = vector.load %arg4[%c0_6, %c0_7] : memref<2x5xf32, #tpu.memory_space<vmem>>, vector<2x5xf32>
    %cst_8 = arith.constant dense<0.000000e+00> : vector<2x512xf32>
    %9 = tpu.matmul %8, %7, %cst_8 {dimension_numbers = #tpu.dot_dimension_numbers<[1], [0], [0], [1], [0, 0, 1, 1], [], []>} : vector<2x5xf32>, vector<5x512xf32>, vector<2x512xf32> -> vector<2x512xf32>
    %c0_9 = arith.constant 0 : index
    %c0_10 = arith.constant 0 : index
    %10 = vector.load %arg5[%c0_9, %c0_10] : memref<2x1xf32, #tpu.memory_space<vmem>>, vector<2x1xf32>
    %11 = vector.broadcast %10 : vector<2x1xf32> to vector<2x512xf32>
    %12 = arith.addf %9, %11 : vector<2x512xf32>
    %c0_11 = arith.constant 0 : index
    %c0_12 = arith.constant 0 : index
    %13 = vector.load %arg6[%c0_11, %c0_12] : memref<2x512xf32, #tpu.memory_space<vmem>>, vector<2x512xf32>
    tpu.vector_store %arg6[%c0_11, %c0_12], %12 {strides = array<i32>} : memref<2x512xf32, #tpu.memory_space<vmem>>, vector<2x512xf32>,
    return
  }
  func.func @transform_0(%arg0: i32) -> (i32, i32) {
    %c0_i32 = arith.constant 0 : i32
    %c0_i32_0 = arith.constant 0 : i32
    return %arg0, %c0_i32 : i32, i32
  }
  func.func @transform_1(%arg0: i32) -> (i32, i32) {
    %c0_i32 = arith.constant 0 : i32
    %c0_i32_0 = arith.constant 0 : i32
    %c0_i32_1 = arith.constant 0 : i32
    return %c0_i32, %c0_i32_0 : i32, i32
  }
  func.func @transform_2(%arg0: i32) -> (i32, i32) {
    %c0_i32 = arith.constant 0 : i32
    %c0_i32_0 = arith.constant 0 : i32
    %c0_i32_1 = arith.constant 0 : i32
    return %c0_i32, %c0_i32_0 : i32, i32
  }
  func.func @transform_3(%arg0: i32) -> (i32, i32) {
    %c0_i32 = arith.constant 0 : i32
    %c0_i32_0 = arith.constant 0 : i32
    %c0_i32_1 = arith.constant 0 : i32
    return %c0_i32, %c0_i32_0 : i32, i32
  }
  func.func @transform_4(%arg0: i32) -> (i32, i32) {
    %c0_i32 = arith.constant 0 : i32
    %c0_i32_0 = arith.constant 0 : i32
    %c0_i32_1 = arith.constant 0 : i32
    return %c0_i32, %c0_i32_0 : i32, i32
  }
  func.func @transform_5(%arg0: i32) -> (i32, i32) {
    %c0_i32 = arith.constant 0 : i32
    %c0_i32_0 = arith.constant 0 : i32
    return %c0_i32, %arg0 : i32, i32
  }
}

</mosaic_0001>

<bundles_post_ra>
// kernel: tpu_custom_call.1
= control target key start
LH: loop header
LB: loop body
LE: loop exit
PB: predicated region body
PF: predicated region fallthrough
CT: control target
= control target key end

     0   :  { %vm92_vm0 = vcmask 80896   ;;  %v902_v7 = vmov 0   ;;  %s1232_s0 = inlined_call_operand.vmem [shape: f32[512,10], index: 0, kind: input, shape index: {}]   ;;  %s1233_s1 = inlined_call_operand.vmem [shape: f32[5,10], index: 1, kind: input, shape index: {}]   ;;  %s1234_s2 = inlined_call_operand.vmem [shape: f32[5,1], index: 2, kind: input, shape index: {}]   ;;  %s1235_s3 = inlined_call_operand.vmem [shape: f32[2,5], index: 3, kind: input, shape index: {}]   ;;  %s1236_s4 = inlined_call_operand.vmem [shape: f32[2,1], index: 4, kind: input, shape index: {}]   ;;  %s1237_s5 = inlined_call_operand.hbm [shape: f32[2,512], index: 5, kind: output, shape index: {}]  }
   0x1   :  { %v37_v0 = vld [vmem:[%s1232_s0 + $0x80] sm:$0xff]  ;;  %v38_v1 = vld [vmem:[%s1232_s0 + $0x88] sm:$0xff]  ;;  %vm947_vm1 = vmpackc.low %vm92_vm0, %vm92_vm0  ;;  %877 = vset.pattern.permute.xlu0 %v902_v7 }
   0x2   :  { %v69_v2 = vld [vmem:[%s1232_s0 + $0x180] sm:$0xff]  ;;  %v777_v3 = vpack.c.bf16 %v38_v1, %v37_v0  ;;  %v70_v5 = vld [vmem:[%s1232_s0 + $0x188] sm:$0xff]  ;;  %v39_v14 = vld [vmem:[%s1232_s0 + $0x90] sm:$0xff] }
   0x3   :  { %v21_v6 = vld [vmem:[%s1232_s0] sm:$0xff]  ;;  %v825_v8 = vpack.c.bf16 %v70_v5, %v69_v2  ;;  %v22_v9 = vld [vmem:[%s1232_s0 + $0x8] sm:$0xff]  ;;  %v40_v15 = vld [vmem:[%s1232_s0 + $0x98] sm:$0xff] }
   0x4   :  { %v53_v10 = vld [vmem:[%s1232_s0 + $0x100] sm:$0xff]  ;;  %v54_v11 = vld [vmem:[%s1232_s0 + $0x108] sm:$0xff]  ;;  %779 = vmatprep.subr.msk.bf16.mxu0 %vm947_vm1, %v777_v3  ;;  %v780_v12 = vpack.c.bf16 %v22_v9, %v21_v6  ;;  %v71_v16 = vld [vmem:[%s1232_s0 + $0x190] sm:$0xff]  ;;  %v783_v17 = vpack.c.bf16 %v40_v15, %v39_v14 }
   0x5   :  { %v828_v13 = vpack.c.bf16 %v54_v11, %v53_v10  ;;  %827 = vmatprep.subr.msk.bf16.mxu1 %vm947_vm1, %v825_v8  ;;  %v72_v18 = vld [vmem:[%s1232_s0 + $0x198] sm:$0xff]  ;;  %v23_v20 = vld [vmem:[%s1232_s0 + $0x10] sm:$0xff]  ;;  %v41_v24 = vld [vmem:[%s1232_s0 + $0xa0] sm:$0xff] }
   0x6   :  { %782 = vmatpush3.bf16.xpose.msk.msra.mxu0 %vm947_vm1, %v780_v12  ;;  %v831_v19 = vpack.c.bf16 %v72_v18, %v71_v16  ;;  %v24_v21 = vld [vmem:[%s1232_s0 + $0x18] sm:$0xff]  ;;  %v55_v22 = vld [vmem:[%s1232_s0 + $0x110] sm:$0xff]  ;;  %v42_v25 = vld [vmem:[%s1232_s0 + $0xa8] sm:$0xff] }
   0x7   :  { %830 = vmatpush3.bf16.xpose.msk.msra.mxu1 %vm947_vm1, %v828_v13  ;;  %785 = vmatprep.subr.msk.bf16.mxu0 %vm947_vm1, %v783_v17  ;;  %v56_v23 = vld [vmem:[%s1232_s0 + $0x118] sm:$0xff]  ;;  %v73_v26 = vld [vmem:[%s1232_s0 + $0x1a0] sm:$0xff]  ;;  %v74_v27 = vld [vmem:[%s1232_s0 + $0x1a8] sm:$0xff]  ;;  %v786_v28 = vpack.c.bf16 %v24_v21, %v23_v20  ;;  %v789_v30 = vpack.c.bf16 %v42_v25, %v41_v24 }
   0x8   :  { %833 = vmatprep.subr.msk.bf16.mxu1 %vm947_vm1, %v831_v19  ;;  %v834_v29 = vpack.c.bf16 %v56_v23, %v55_v22  ;;  %v837_v31 = vpack.c.bf16 %v74_v27, %v73_v26  ;;  %v25_v32 = vld [vmem:[%s1232_s0 + $0x20] sm:$0xff]  ;;  %v26_v33 = vld [vmem:[%s1232_s0 + $0x28] sm:$0xff]  ;;  %v43_v36 = vld [vmem:[%s1232_s0 + $0xb0] sm:$0xff] }
   0x9   :  { %v57_v34 = vld [vmem:[%s1232_s0 + $0x120] sm:$0xff]  ;;  %v58_v35 = vld [vmem:[%s1232_s0 + $0x128] sm:$0xff]  ;;  %v44_v37 = vld [vmem:[%s1232_s0 + $0xb8] sm:$0xff]  ;;  %v792_v40 = vpack.c.bf16 %v26_v33, %v25_v32 }
   0xa   :  { %v75_v38 = vld [vmem:[%s1232_s0 + $0x1b0] sm:$0xff]  ;;  %v76_v39 = vld [vmem:[%s1232_s0 + $0x1b8] sm:$0xff]  ;;  %v840_v41 = vpack.c.bf16 %v58_v35, %v57_v34  ;;  %v795_v42 = vpack.c.bf16 %v44_v37, %v43_v36  ;;  %v1065_v48 = vld [vmem:[%s1233_s1] sm:$0x1f] }
   0xb   :  { %v843_v43 = vpack.c.bf16 %v76_v39, %v75_v38  ;;  %v27_v44 = vld [vmem:[%s1232_s0 + $0x30] sm:$0xff]  ;;  %v28_v45 = vld [vmem:[%s1232_s0 + $0x38] sm:$0xff]  ;;  %v45_v49 = vld [vmem:[%s1232_s0 + $0xc0] sm:$0xff] }
   0xc   :  { %v59_v46 = vld [vmem:[%s1232_s0 + $0x130] sm:$0xff]  ;;  %v60_v47 = vld [vmem:[%s1232_s0 + $0x138] sm:$0xff]  ;;  %v86_v50 = vld [vmem:[%s1234_s2] sm:$0x1f] }
   0xe   :  { %788 = vmatpush3.bf16.xpose.msk.msra.mxu0 %vm947_vm1, %v786_v28 }
   0xf   :  { %836 = vmatpush3.bf16.xpose.msk.msra.mxu1 %vm947_vm1, %v834_v29  ;;  %791 = vmatprep.subr.msk.bf16.mxu0 %vm947_vm1, %v789_v30 }
  0x10   :  { %839 = vmatprep.subr.msk.bf16.mxu1 %vm947_vm1, %v837_v31 }
  0x16   :  { %794 = vmatpush3.bf16.xpose.msk.msra.mxu0 %vm947_vm1, %v792_v40 }
  0x17   :  { %842 = vmatpush3.bf16.xpose.msk.msra.mxu1 %vm947_vm1, %v840_v41  ;;  %797 = vmatprep.subr.msk.bf16.mxu0 %vm947_vm1, %v795_v42 }
  0x18   :  { %845 = vmatprep.subr.msk.bf16.mxu1 %vm947_vm1, %v843_v43 }
  0x19   :  { %10 = vsyncpa [#allocation3], 0  ;;  %v46_v51 = vld [vmem:[%s1232_s0 + $0xc8] sm:$0xff]  ;;  %v77_v52 = vld [vmem:[%s1232_s0 + $0x1c0] sm:$0xff]  ;;  %741 = vmatprep.mubr.msk.f32.mxu0 %vm92_vm0, %v1065_v48  ;;  %775 = vmatprep.mubr.msk.f32.mxu1 %vm92_vm0, %v1065_v48  ;;  %v798_v54 = vpack.c.bf16 %v28_v45, %v27_v44  ;;  %v846_v55 = vpack.c.bf16 %v60_v47, %v59_v46  ;;  %v903_v38 = vmov 0.0   ;;  %vm445_vm2 = vcmask 1044480  }
  0x1a   :  { %v78_v53 = vld [vmem:[%s1232_s0 + $0x1c8] sm:$0xff]  ;;  %89 = vperm.xlu0 %877, %v86_v50   ;;  %v435_v56 = vld [vmem:[%s1236_s4] sm:$0x3]  ;;  %v801_v57 = vpack.c.bf16 %v46_v51, %v45_v49  ;;  %v47_v63 = vld [vmem:[%s1232_s0 + $0xd0] sm:$0xff]  ;;  %vm441_vm3 = vcmask 39936  }
  0x1b   :  { %v849_v58 = vpack.c.bf16 %v78_v53, %v77_v52  ;;  %v29_v59 = vld [vmem:[%s1232_s0 + $0x40] sm:$0xff]  ;;  %v30_v60 = vld [vmem:[%s1232_s0 + $0x48] sm:$0xff]  ;;  %v48_v0 = vld [vmem:[%s1232_s0 + $0xd8] sm:$0xff]  ;;  %v904_v52 = vmov 1983009808  }
  0x1c   :  { %v61_v61 = vld [vmem:[%s1232_s0 + $0x140] sm:$0xff]  ;;  %v62_v62 = vld [vmem:[%s1232_s0 + $0x148] sm:$0xff]  ;;  %v79_v1 = vld [vmem:[%s1232_s0 + $0x1d0] sm:$0xff]  ;;  %v804_v3 = vpack.c.bf16 %v30_v60, %v29_v59  ;;  %v807_v6 = vpack.c.bf16 %v48_v0, %v47_v63  ;;  %v607_v53 = vunpack.c.l.s4 %v904_v52 }
  0x1d   :  { %v80_v2 = vld [vmem:[%s1232_s0 + $0x1d8] sm:$0xff]  ;;  %v852_v5 = vpack.c.bf16 %v62_v62, %v61_v61  ;;  %v31_v8 = vld [vmem:[%s1232_s0 + $0x50] sm:$0xff]  ;;  %v49_v12 = vld [vmem:[%s1232_s0 + $0xe0] sm:$0xff] }
  0x1e   :  { %438 = vperm.xlu0 %877, %v435_v56   ;;  %800 = vmatpush3.bf16.xpose.msk.msra.mxu0 %vm947_vm1, %v798_v54  ;;  %v855_v7 = vpack.c.bf16 %v80_v2, %v79_v1  ;;  %v32_v9 = vld [vmem:[%s1232_s0 + $0x58] sm:$0xff]  ;;  %v63_v10 = vld [vmem:[%s1232_s0 + $0x150] sm:$0xff]  ;;  %v50_v13 = vld [vmem:[%s1232_s0 + $0xe8] sm:$0xff]  ;;  %v609_v54 = vlaneseq }
  0x1f   :  { %848 = vmatpush3.bf16.xpose.msk.msra.mxu1 %vm947_vm1, %v846_v55  ;;  %803 = vmatprep.subr.msk.bf16.mxu0 %vm947_vm1, %v801_v57  ;;  %v64_v11 = vld [vmem:[%s1232_s0 + $0x158] sm:$0xff]  ;;  %v81_v14 = vld [vmem:[%s1232_s0 + $0x1e0] sm:$0xff]  ;;  %v82_v15 = vld [vmem:[%s1232_s0 + $0x1e8] sm:$0xff]  ;;  %v810_v16 = vpack.c.bf16 %v32_v9, %v31_v8  ;;  %v813_v18 = vpack.c.bf16 %v50_v13, %v49_v12  ;;  %v608_v55 = vunpack.c.0.s8 %v607_v53 }
  0x20   :  { %851 = vmatprep.subr.msk.bf16.mxu1 %vm947_vm1, %v849_v58  ;;  %v858_v17 = vpack.c.bf16 %v64_v11, %v63_v10  ;;  %v861_v19 = vpack.c.bf16 %v82_v15, %v81_v14  ;;  %v33_v20 = vld [vmem:[%s1232_s0 + $0x60] sm:$0xff]  ;;  %v34_v21 = vld [vmem:[%s1232_s0 + $0x68] sm:$0xff]  ;;  %v51_v24 = vld [vmem:[%s1232_s0 + $0xf0] sm:$0xff]  ;;  %v610_v56 = vshrl.u32 %v609_v54, 7 }
  0x21   :  { %v65_v22 = vld [vmem:[%s1232_s0 + $0x160] sm:$0xff]  ;;  %v66_v23 = vld [vmem:[%s1232_s0 + $0x168] sm:$0xff]  ;;  %v52_v25 = vld [vmem:[%s1232_s0 + $0xf8] sm:$0xff]  ;;  %v816_v28 = vpack.c.bf16 %v34_v21, %v33_v20 }
  0x22   :  { %v83_v26 = vld [vmem:[%s1232_s0 + $0x1f0] sm:$0xff]  ;;  %v84_v27 = vld [vmem:[%s1232_s0 + $0x1f8] sm:$0xff]  ;;  %v864_v29 = vpack.c.bf16 %v66_v23, %v65_v22  ;;  %v819_v30 = vpack.c.bf16 %v52_v25, %v51_v24  ;;  %v611_v2 = vsub.s32 %v608_v55, %v610_v56 }
  0x23   :  { %v867_v31 = vpack.c.bf16 %v84_v27, %v83_v26  ;;  %v35_v32 = vld [vmem:[%s1232_s0 + $0x70] sm:$0xff]  ;;  %v36_v33 = vld [vmem:[%s1232_s0 + $0x78] sm:$0xff] }
  0x24   :  { %v67_v34 = vld [vmem:[%s1232_s0 + $0x170] sm:$0xff]  ;;  %v68_v35 = vld [vmem:[%s1232_s0 + $0x178] sm:$0xff]  ;;  %v822_v36 = vpack.c.bf16 %v36_v33, %v35_v32 }
  0x25   :  { %v870_v37 = vpack.c.bf16 %v68_v35, %v67_v34 }
  0x26   :  { %806 = vmatpush3.bf16.xpose.msk.msra.mxu0 %vm947_vm1, %v804_v3 }
  0x27   :  { %854 = vmatpush3.bf16.xpose.msk.msra.mxu1 %vm947_vm1, %v852_v5  ;;  %809 = vmatprep.subr.msk.bf16.mxu0 %vm947_vm1, %v807_v6 }
  0x28   :  { %857 = vmatprep.subr.msk.bf16.mxu1 %vm947_vm1, %v855_v7 }
  0x2e   :  { %812 = vmatpush3.bf16.xpose.msk.msra.mxu0 %vm947_vm1, %v810_v16 }
  0x2f   :  { %860 = vmatpush3.bf16.xpose.msk.msra.mxu1 %vm947_vm1, %v858_v17  ;;  %815 = vmatprep.subr.msk.bf16.mxu0 %vm947_vm1, %v813_v18 }
  0x30   :  { %863 = vmatprep.subr.msk.bf16.mxu1 %vm947_vm1, %v861_v19 }
  0x36   :  { %818 = vmatpush3.bf16.xpose.msk.msra.mxu0 %vm947_vm1, %v816_v28 }
  0x37   :  { %866 = vmatpush3.bf16.xpose.msk.msra.mxu1 %vm947_vm1, %v864_v29  ;;  %821 = vmatprep.subr.msk.bf16.mxu0 %vm947_vm1, %v819_v30 }
  0x38   :  { %869 = vmatprep.subr.msk.bf16.mxu1 %vm947_vm1, %v867_v31 }
  0x3e   :  { %824 = vmatpush3.bf16.xpose.msk.msra.mxu0 %vm947_vm1, %v822_v36 }
  0x3f   :  { %872 = vmatpush3.bf16.xpose.msk.msra.mxu1 %vm947_vm1, %v870_v37 }
  0x45   :  { %742 = vmatmul.mubr.msk.f32.vlgmr.msra.gmra.mrb[0].mxu0 %vm92_vm0, %v1065_v48 }
  0x46   :  { %776 = vmatmul.mubr.msk.f32.vlgmr.msra.gmra.mrb[0].mxu1 %vm92_vm0, %v1065_v48  ;;  %522 = vmatprep.mubr.f32.mxu0 %v903_v38  ;;  %v434_v48 = vld [vmem:[%s1235_s3] sm:$0x3]  ;;  %s905_s3 = smov [#allocation2]  }
  0x47   :  { %593 = vmatprep.mubr.f32.mxu1 %v903_v38  ;;  %s629_s20 = sshll.u32 %s905_s3, 4  ;;  %s630_s20 = int_to_ptr.vmem [resolvable:$true] %s629_s20 }
  0x48   :  { %s878_s21 = scalar_lea.vmem %s630_s20, 128  ;;  %p883_p1 = scmp.lt.s32.totalorder %s630_s20, %s630_s20 }
  0x49   :  { %p879_p0 = scmp.ne.s32.totalorder %s630_s20, %s878_s21  ;;  %p884_p2 = scmp.lt.s32.totalorder %s878_s21, %s878_s21 }
  0x4b   :  { %p885_p3 = por %p884_p2, %p883_p1 }
  0x4d   :  { %p886_p4 = pnand %p885_p3, %p879_p0 }
  0x99   :  { %v90_v39 = vpop.permute.xlu0 %89 }
  0x9d   :  { %v439_v57 = vpop.permute.xlu0 %438 }
 0x118   :  { %v354_v40 = vpop.f32.mrb[0].mxu0 }
 0x119   :  { %v425_v41 = vpop.f32.mrb[0].mxu1  ;;  %v355_v42 = vadd.f32 %v354_v40, %v90_v39  ;;  %v356_v44 = vpop.f32.mrb[1].mxu0 }
 0x11a   :  { %v426_v43 = vadd.f32 %v425_v41, %v90_v39  ;;  %v427_v45 = vpop.f32.mrb[1].mxu1  ;;  %v357_v46 = vadd.f32 %v356_v44, %v90_v39 }
 0x11b   :  { %v428_v47 = vadd.f32 %v427_v45, %v90_v39  ;;  %v430_v50 = vmax.f32 %v355_v42, 0.0 }
 0x11c   :  { %v431_v4 = vmax.f32 %v357_v46, 0.0  ;;  %v432_v51 = vmax.f32 %v426_v43, 0.0 }
 0x11d   :  { %v433_v49 = vmax.f32 %v428_v47, 0.0 }
 0x11e   :  { %703 = vmatprep.subr.msk.mxu0 %vm445_vm2, %v431_v4 }
 0x11f   :  { %706 = vmatprep.subr.msk.mxu1 %vm445_vm2, %v433_v49  ;;  %704 = vmatpush1.msk.msra.mxu0 %vm445_vm2, %v430_v50 }
 0x120   :  { %707 = vmatpush1.msk.msra.mxu1 %vm445_vm2, %v432_v51  ;;  %705 = vmatmul.mubr.msk.f32.vlgmr.msra.gmra.mrb[2].mxu0 %vm441_vm3, %v434_v48 }
 0x121   :  { %708 = vmatmul.mubr.msk.f32.vlgmr.msra.gmra.mrb[2].mxu1 %vm441_vm3, %v434_v48 }
 0x1f3   :  { %v524_v58 = vpop.f32.mrb[2].mxu0 }
 0x1f4   :  { %v595_v59 = vpop.f32.mrb[2].mxu1  ;;  %v525_v60 = vadd.f32 %v524_v58, %v439_v57  ;;  %v526_v62 = vpop.f32.mrb[3].mxu0 }
 0x1f5   :  { %v596_v61 = vadd.f32 %v595_v59, %v439_v57  ;;  %v597_v63 = vpop.f32.mrb[3].mxu1  ;;  %v527_v0 = vadd.f32 %v526_v62, %v439_v57 }
 0x1f6   :  { %v598_v1 = vadd.f32 %v597_v63, %v439_v57 }
 0x1f7   :  { %v604_v3 = vcombine.low %v525_v60, %v527_v0 }
 0x1f8   :  { %v605_v5 = vcombine.low %v596_v61, %v598_v1 }
 0x1f9   :  { %v612_v6 = vrot.slane %v604_v3, %v611_v2 }
 0x1fa   :  { %v619_v7 = vrot.slane %v605_v5, %v611_v2 }
 0x1fc   :  { %v620_v8 = vcombine.low %v612_v6, %v619_v7 }
 0x1fe   :  { %622 = vst [vmem:[#allocation2] sm:$0xff] %v620_v8 }
 0x1ff   :  { %889 = shalt.err (!%p886_p4)
}
 0x200   :  { %s890_s23 = scalar_lea.hbm %s1237_s5, 128 }
 0x201   :  { %p891_p5 = scmp.ne.s32.totalorder %s1237_s5, %s890_s23  ;;  %p894_p6 = scmp.lt.u32.totalorder %s890_s23, %s1237_s5 }
 0x203   :  { %p896_p7 = pnand %p894_p6, %p891_p5 }
 0x205   :  { %899 = shalt.err (!%p896_p7)
}
 0x206   :  { %632 = dma.vmem_to_hbm [thread:$0]  %s630_s20, 128, %s1237_s5, [#allocation3]  }
 0x207   :  { %900 = dma.done.wait [#allocation3], 128  }
 0x208   :  { %901 = vsyncadd [#allocation3], 4294967168 }
 0x209   :  { %636 = vsyncpa [#allocation3], 1 }

</bundles_post_ra>
